<compile_context>
chip_gen: v6e
topology: v6e:2x2x1
jax: 0.10.0
libtpu: 0.0.40
codegen_flags: <defaults>
</compile_context>

<pallas_src>
import functools

import jax
import jax.numpy as jnp
from jax import lax
from jax.experimental import pallas as pl
from jax.experimental.pallas import tpu as pltpu


def _round_up(n, m):
    return ((n + m - 1) // m) * m


def _cdiv(a, b):
    return -(-a // b)


def _device_kind():
    try:
        return jax.devices()[0].device_kind.lower()
    except Exception:
        return ""


def _has_bf16_vpu():
    # v6e / v7x have a bf16 VPU path; v5e and older (or unknown) -> keep f32 elementwise.
    k = _device_kind()
    return ("v6" in k) or ("v7" in k) or ("7x" in k)


def _num_tensorcores():
    # v7x has 2 TensorCores per chip; everything else we target has 1.
    k = _device_kind()
    if ("v7" in k) or ("7x" in k):
        return 2
    try:
        return max(1, int(getattr(jax.devices()[0], "num_cores", 1)))
    except Exception:
        return 1


def _choose_tiling(B, *, tile_cap=4096, num_cores=1):
    """Pick (tile_b, b_pad, grid_n): big lane-aligned tiles; single step for small B;
    an even number of parallel steps on dual-TC chips when the batch is large."""
    b128 = _round_up(max(B, 1), 128)
    tile_cap = _round_up(max(tile_cap, 128), 128)
    if num_cores >= 2 and b128 >= 2048:
        n_steps = max(2, 2 * _cdiv(b128, 2 * tile_cap))
        tile_b = _round_up(_cdiv(b128, n_steps), 128)
    else:
        tile_b = b128 if b128 <= tile_cap else tile_cap
    b_pad = _round_up(b128, tile_b)
    return tile_b, b_pad, b_pad // tile_b


def _mlp_softmax_kernel(x_ref, w1_ref, b1_ref, w2_ref, b2_ref, w3_ref, b3_ref, o_ref,
                        *, matmul_dtype, bf16_hidden):
    """Fused transposed MLP + softmax.

    x_ref:  (tile_b, i_dim) f32, natural layout (cast to matmul_dtype in-kernel).
    wN_ref: transposed weights (out_features, in_features), matmul_dtype.
    bN_ref: (out_features, 1) biases (bf16 for hidden layers on v6e/v7x, else f32).
    o_ref:  (o_dim, tile_b) f32 -- features on sublanes, batch on lanes (lane-dense).
    """
    x = x_ref[...].astype(matmul_dtype)  # cast hidden under the input DMA

    # h1 = relu(W1 @ x^T + b1): contract i_dim = last dim of both operands -> (64, tile_b)
    h1 = lax.dot_general(w1_ref[...], x, (((1,), (1,)), ((), ())),
                         preferred_element_type=jnp.float32)
    if bf16_hidden:
        h1 = jnp.maximum(h1.astype(jnp.bfloat16) + b1_ref[...], 0)
    else:
        h1 = jnp.maximum(h1 + b1_ref[...], 0.0).astype(matmul_dtype)

    # h2 = relu(W2 @ h1 + b2) -> (32, tile_b)
    h2 = jnp.dot(w2_ref[...], h1, preferred_element_type=jnp.float32)
    if bf16_hidden:
        h2 = jnp.maximum(h2.astype(jnp.bfloat16) + b2_ref[...], 0)
    else:
        h2 = jnp.maximum(h2 + b2_ref[...], 0.0).astype(matmul_dtype)

    # Final layer + softmax stay f32 (correct on all generations).
    h3 = jnp.dot(w3_ref[...], h2, preferred_element_type=jnp.float32)  # (o_dim, tile_b)
    h3 = jnp.maximum(h3 + b3_ref[...], 0.0)

    # Numerically stable softmax over the feature (sublane) axis.
    z = h3 - jnp.max(h3, axis=0, keepdims=True)
    e = jnp.exp(z)
    inv = pl.reciprocal(jnp.sum(e, axis=0, keepdims=True), approx=True)  # EUP slot
    o_ref[...] = (e * inv).astype(o_ref.dtype)


def prepare_params(params, *, matmul_dtype=jnp.bfloat16, bf16_hidden=None):
    """One-time layout plumbing: transpose weights, reshape biases to columns, cast.

    Hoisted out of the forward path so no per-call XLA transpose/cast ops remain.
    """
    matmul_dtype = jnp.dtype(matmul_dtype)
    if bf16_hidden is None:
        bf16_hidden = _has_bf16_vpu()
    bf16_hidden = bool(bf16_hidden) and matmul_dtype == jnp.dtype(jnp.bfloat16)
    hid_dtype = jnp.bfloat16 if bf16_hidden else jnp.float32
    return {
        "w1T": params["w1"].T.astype(matmul_dtype),               # (64, i_dim)
        "w2T": params["w2"].T.astype(matmul_dtype),               # (32, 64)
        "w3T": params["w3"].T.astype(matmul_dtype),               # (o_dim, 32)
        "b1T": params["b1"].reshape(-1, 1).astype(hid_dtype),     # (64, 1)
        "b2T": params["b2"].reshape(-1, 1).astype(hid_dtype),     # (32, 1)
        "b3T": params["b3"].reshape(-1, 1).astype(jnp.float32),   # (o_dim, 1)
        "matmul_dtype": matmul_dtype,
        "bf16_hidden": bf16_hidden,
    }


def nn_p_forward(x, prep, *, tile_cap=4096):
    """x: (B, i_dim) float32; prep: output of prepare_params.

    Returns softmax probabilities of shape (B, o_dim), matching PyTorch NN_P.forward.
    """
    B, i_dim = x.shape
    o_dim = prep["w3T"].shape[0]

    tile_b, b_pad, grid_n = _choose_tiling(
        B, tile_cap=tile_cap, num_cores=_num_tensorcores())

    # Only remaining wrapper-side data movement: zero-pad the batch to the tile grid.
    x_p = x if b_pad == B else jnp.pad(x, ((0, b_pad - B), (0, 0)))

    kernel = functools.partial(
        _mlp_softmax_kernel,
        matmul_dtype=prep["matmul_dtype"],
        bf16_hidden=prep["bf16_hidden"],
    )

    def whole(arr):
        # Tiny array, same block every grid step -> DMA'd once, stays VMEM-resident.
        return pl.BlockSpec(arr.shape, lambda i: (0,) * arr.ndim)

    outT = pl.pallas_call(
        kernel,
        out_shape=jax.ShapeDtypeStruct((o_dim, b_pad), jnp.float32),
        grid=(grid_n,),
        in_specs=[
            # x in natural layout: block is fully contiguous in HBM.
            pl.BlockSpec((tile_b, i_dim), lambda i: (i, 0)),
            whole(prep["w1T"]), whole(prep["b1T"]),
            whole(prep["w2T"]), whole(prep["b2T"]),
            whole(prep["w3T"]), whole(prep["b3T"]),
        ],
        out_specs=pl.BlockSpec((o_dim, tile_b), lambda i: (0, i)),
        compiler_params=pltpu.CompilerParams(
            dimension_semantics=("parallel",),
            vmem_limit_bytes=32 * 1024 * 1024,  # headroom for large tiles (v5e default is 16 MiB)
        ),
    )(x_p, prep["w1T"], prep["b1T"], prep["w2T"], prep["b2T"], prep["w3T"], prep["b3T"])

    # Slice off batch padding and return PyTorch layout (B, o_dim).
    return outT[:, :B].T


def init_params(key, i_dim, o_dim):
    """Deterministic synthetic params matching NN_P(i_dim, o_dim) shapes (f32 master copy)."""
    dims = [(i_dim, 64), (64, 32), (32, o_dim)]
    params = {}
    for n, (fan_in, fan_out) in enumerate(dims, start=1):
        key, kw, kb = jax.random.split(key, 3)
        bound = 1.0 / jnp.sqrt(fan_in)  # same scale as PyTorch Linear default init
        params[f"w{n}"] = jax.random.uniform(
            kw, (fan_in, fan_out), jnp.float32, minval=-bound, maxval=bound)
        params[f"b{n}"] = jax.random.uniform(
            kb, (1, fan_out), jnp.float32, minval=-bound, maxval=bound)
    return params


def reference_forward(x, params):
    h = jnp.maximum(x @ params["w1"] + params["b1"], 0.0)
    h = jnp.maximum(h @ params["w2"] + params["b2"], 0.0)
    h = jnp.maximum(h @ params["w3"] + params["b3"], 0.0)
    return jax.nn.softmax(h, axis=-1)


if __name__ == "__main__":
    key = jax.random.PRNGKey(0)
    i_dim, o_dim, batch = 16, 4, 8

    key, kx = jax.random.split(key)
    x = jax.random.normal(kx, (batch, i_dim), dtype=jnp.float32)
    params = init_params(key, i_dim, o_dim)
    prep = prepare_params(params)   # one-time layout plumbing, hoisted out of forward

    out = jax.block_until_ready(nn_p_forward(x, prep))

    ref = reference_forward(x, params)
    assert out.shape == (batch, o_dim)
    # bf16 MXU operands + approx softmax reciprocal -> relaxed tolerance vs f32 reference.
    assert jnp.allclose(jnp.sum(out, axis=-1), 1.0, atol=1e-2)
    assert jnp.allclose(out, ref, atol=1e-2, rtol=1e-2)

    print("KERNEL_OK")
</pallas_src>

<mosaic_0001>
module attributes {stable_mosaic.version = 11 : i64} {
  func.func @_mlp_softmax_kernel(%arg0: i32, %arg1: memref<128x16xf32, #tpu.memory_space<vmem>>, %arg2: memref<64x16xbf16, #tpu.memory_space<vmem>>, %arg3: memref<64x1xf32, #tpu.memory_space<vmem>>, %arg4: memref<32x64xbf16, #tpu.memory_space<vmem>>, %arg5: memref<32x1xf32, #tpu.memory_space<vmem>>, %arg6: memref<4x32xbf16, #tpu.memory_space<vmem>>, %arg7: memref<4x1xf32, #tpu.memory_space<vmem>>, %arg8: memref<4x128xf32, #tpu.memory_space<vmem>>) attributes {dimension_semantics = [#tpu.dimension_semantics<parallel>], iteration_bounds = array<i64: 1>, scalar_prefetch = 0 : i64, scratch_operands = 0 : i64, tpu.core_type = #tpu.core_type<tc>, window_params = [{transform_indices = @transform_0, window_bounds = array<i64: 128, 16>}, {pipeline_mode = #tpu.pipeline_mode<synchronous>, transform_indices = @transform_1, window_bounds = array<i64: 64, 16>}, {pipeline_mode = #tpu.pipeline_mode<synchronous>, transform_indices = @transform_2, window_bounds = array<i64: 64, 1>}, {pipeline_mode = #tpu.pipeline_mode<synchronous>, transform_indices = @transform_3, window_bounds = array<i64: 32, 64>}, {pipeline_mode = #tpu.pipeline_mode<synchronous>, transform_indices = @transform_4, window_bounds = array<i64: 32, 1>}, {pipeline_mode = #tpu.pipeline_mode<synchronous>, transform_indices = @transform_5, window_bounds = array<i64: 4, 32>}, {pipeline_mode = #tpu.pipeline_mode<synchronous>, transform_indices = @transform_6, window_bounds = array<i64: 4, 1>}, {transform_indices = @transform_7, window_bounds = array<i64: 4, 128>}]} {
    %c0 = arith.constant 0 : index
    %c0_0 = arith.constant 0 : index
    %0 = vector.load %arg1[%c0, %c0_0] : memref<128x16xf32, #tpu.memory_space<vmem>>, vector<128x16xf32>
    %1 = arith.truncf %0 : vector<128x16xf32> to vector<128x16xbf16>
    %c0_1 = arith.constant 0 : index
    %c0_2 = arith.constant 0 : index
    %2 = vector.load %arg2[%c0_1, %c0_2] : memref<64x16xbf16, #tpu.memory_space<vmem>>, vector<64x16xbf16>
    %cst = arith.constant dense<0.000000e+00> : vector<64x128xf32>
    %3 = tpu.matmul %2, %1, %cst {dimension_numbers = #tpu.dot_dimension_numbers<[1], [1], [0], [0], [0, 0, 1, 0], [], []>} : vector<64x16xbf16>, vector<128x16xbf16>, vector<64x128xf32> -> vector<64x128xf32>
    %c0_3 = arith.constant 0 : index
    %c0_4 = arith.constant 0 : index
    %4 = vector.load %arg3[%c0_3, %c0_4] : memref<64x1xf32, #tpu.memory_space<vmem>>, vector<64x1xf32>
    %5 = vector.broadcast %4 : vector<64x1xf32> to vector<64x128xf32>
    %6 = arith.addf %3, %5 : vector<64x128xf32>
    %cst_5 = arith.constant 0.000000e+00 : f32
    %7 = vector.broadcast %cst_5 : f32 to vector<64x128xf32>
    %8 = arith.maximumf %6, %7 : vector<64x128xf32>
    %9 = arith.truncf %8 : vector<64x128xf32> to vector<64x128xbf16>
    %c0_6 = arith.constant 0 : index
    %c0_7 = arith.constant 0 : index
    %10 = vector.load %arg4[%c0_6, %c0_7] : memref<32x64xbf16, #tpu.memory_space<vmem>>, vector<32x64xbf16>
    %cst_8 = arith.constant dense<0.000000e+00> : vector<32x128xf32>
    %11 = tpu.matmul %10, %9, %cst_8 {dimension_numbers = #tpu.dot_dimension_numbers<[1], [0], [0], [1], [0, 0, 1, 1], [], []>} : vector<32x64xbf16>, vector<64x128xbf16>, vector<32x128xf32> -> vector<32x128xf32>
    %c0_9 = arith.constant 0 : index
    %c0_10 = arith.constant 0 : index
    %12 = vector.load %arg5[%c0_9, %c0_10] : memref<32x1xf32, #tpu.memory_space<vmem>>, vector<32x1xf32>
    %13 = vector.broadcast %12 : vector<32x1xf32> to vector<32x128xf32>
    %14 = arith.addf %11, %13 : vector<32x128xf32>
    %cst_11 = arith.constant 0.000000e+00 : f32
    %15 = vector.broadcast %cst_11 : f32 to vector<32x128xf32>
    %16 = arith.maximumf %14, %15 : vector<32x128xf32>
    %17 = arith.truncf %16 : vector<32x128xf32> to vector<32x128xbf16>
    %c0_12 = arith.constant 0 : index
    %c0_13 = arith.constant 0 : index
    %18 = vector.load %arg6[%c0_12, %c0_13] : memref<4x32xbf16, #tpu.memory_space<vmem>>, vector<4x32xbf16>
    %cst_14 = arith.constant dense<0.000000e+00> : vector<4x128xf32>
    %19 = tpu.matmul %18, %17, %cst_14 {dimension_numbers = #tpu.dot_dimension_numbers<[1], [0], [0], [1], [0, 0, 1, 1], [], []>} : vector<4x32xbf16>, vector<32x128xbf16>, vector<4x128xf32> -> vector<4x128xf32>
    %c0_15 = arith.constant 0 : index
    %c0_16 = arith.constant 0 : index
    %20 = vector.load %arg7[%c0_15, %c0_16] : memref<4x1xf32, #tpu.memory_space<vmem>>, vector<4x1xf32>
    %21 = vector.broadcast %20 : vector<4x1xf32> to vector<4x128xf32>
    %22 = arith.addf %19, %21 : vector<4x128xf32>
    %cst_17 = arith.constant 0.000000e+00 : f32
    %23 = vector.broadcast %cst_17 : f32 to vector<4x128xf32>
    %24 = arith.maximumf %22, %23 : vector<4x128xf32>
    %cst_18 = arith.constant dense<0xFF800000> : vector<128xf32>
    %25 = vector.multi_reduction <maximumf>, %24, %cst_18 [0] : vector<4x128xf32> to vector<128xf32>
    %26 = vector.shape_cast %25 : vector<128xf32> to vector<1x128xf32>
    %27 = vector.broadcast %26 : vector<1x128xf32> to vector<4x128xf32>
    %28 = arith.subf %24, %27 : vector<4x128xf32>
    %29 = math.exp %28 : vector<4x128xf32>
    %cst_19 = arith.constant dense<0.000000e+00> : vector<128xf32>
    %30 = vector.multi_reduction <add>, %29, %cst_19 [0] : vector<4x128xf32> to vector<128xf32>
    %31 = vector.shape_cast %30 : vector<128xf32> to vector<1x128xf32>
    %32 = tpu.reciprocal %31 {approx = true} : vector<1x128xf32> -> vector<1x128xf32>
    %33 = vector.broadcast %32 : vector<1x128xf32> to vector<4x128xf32>
    %34 = arith.mulf %29, %33 : vector<4x128xf32>
    %c0_20 = arith.constant 0 : index
    %c0_21 = arith.constant 0 : index
    %35 = vector.load %arg8[%c0_20, %c0_21] : memref<4x128xf32, #tpu.memory_space<vmem>>, vector<4x128xf32>
    tpu.vector_store %arg8[%c0_20, %c0_21], %34 {strides = array<i32>} : memref<4x128xf32, #tpu.memory_space<vmem>>, vector<4x128xf32>,
    return
  }
  func.func @transform_0(%arg0: i32) -> (i32, i32) {
    %c0_i32 = arith.constant 0 : i32
    %c0_i32_0 = arith.constant 0 : i32
    return %arg0, %c0_i32 : i32, i32
  }
  func.func @transform_1(%arg0: i32) -> (i32, i32) {
    %c0_i32 = arith.constant 0 : i32
    %c0_i32_0 = arith.constant 0 : i32
    %c0_i32_1 = arith.constant 0 : i32
    return %c0_i32, %c0_i32_0 : i32, i32
  }
  func.func @transform_2(%arg0: i32) -> (i32, i32) {
    %c0_i32 = arith.constant 0 : i32
    %c0_i32_0 = arith.constant 0 : i32
    %c0_i32_1 = arith.constant 0 : i32
    return %c0_i32, %c0_i32_0 : i32, i32
  }
  func.func @transform_3(%arg0: i32) -> (i32, i32) {
    %c0_i32 = arith.constant 0 : i32
    %c0_i32_0 = arith.constant 0 : i32
    %c0_i32_1 = arith.constant 0 : i32
    return %c0_i32, %c0_i32_0 : i32, i32
  }
  func.func @transform_4(%arg0: i32) -> (i32, i32) {
    %c0_i32 = arith.constant 0 : i32
    %c0_i32_0 = arith.constant 0 : i32
    %c0_i32_1 = arith.constant 0 : i32
    return %c0_i32, %c0_i32_0 : i32, i32
  }
  func.func @transform_5(%arg0: i32) -> (i32, i32) {
    %c0_i32 = arith.constant 0 : i32
    %c0_i32_0 = arith.constant 0 : i32
    %c0_i32_1 = arith.constant 0 : i32
    return %c0_i32, %c0_i32_0 : i32, i32
  }
  func.func @transform_6(%arg0: i32) -> (i32, i32) {
    %c0_i32 = arith.constant 0 : i32
    %c0_i32_0 = arith.constant 0 : i32
    %c0_i32_1 = arith.constant 0 : i32
    return %c0_i32, %c0_i32_0 : i32, i32
  }
  func.func @transform_7(%arg0: i32) -> (i32, i32) {
    %c0_i32 = arith.constant 0 : i32
    %c0_i32_0 = arith.constant 0 : i32
    return %c0_i32, %arg0 : i32, i32
  }
}

</mosaic_0001>

<bundles_post_ra>
// kernel: tpu_custom_call.1
= control target key start
LH: loop header
LB: loop body
LE: loop exit
PB: predicated region body
PF: predicated region fallthrough
CT: control target
= control target key end

     0   :  { %vm128_vm0 = vcmask 130048   ;;  %v553_v5 = vmov 0   ;;  %s732_s0 = inlined_call_operand.vmem [shape: f32[128,16], index: 0, kind: input, shape index: {}]   ;;  %s733_s1 = inlined_call_operand.vmem [shape: bf16[64,16], index: 1, kind: input, shape index: {}]   ;;  %s734_s2 = inlined_call_operand.vmem [shape: f32[64,1], index: 2, kind: input, shape index: {}]   ;;  %s735_s3 = inlined_call_operand.vmem [shape: bf16[32,64], index: 3, kind: input, shape index: {}]   ;;  %s736_s4 = inlined_call_operand.vmem [shape: f32[32,1], index: 4, kind: input, shape index: {}]   ;;  %s737_s5 = inlined_call_operand.vmem [shape: bf16[4,32], index: 5, kind: input, shape index: {}]   ;;  %s738_s6 = inlined_call_operand.vmem [shape: f32[4,1], index: 6, kind: input, shape index: {}]   ;;  %s739_s7 = inlined_call_operand.hbm [shape: f32[4,128], index: 7, kind: output, shape index: {}]  }
   0x1   :  { %v42_v0 = vld [vmem:[%s732_s0 + $0x70] sm:$0xff]  ;;  %v43_v1 = vld [vmem:[%s732_s0 + $0x78] sm:$0xff]  ;;  %v40_v2 = vld [vmem:[%s732_s0 + $0x60] sm:$0xff]  ;;  %519 = vset.pattern.permute.xlu0 %v553_v5  ;;  %520 = vset.pattern.permute.xlu1 %v553_v5 }
   0x2   :  { %v51_v3 = vpack.c.bf16 %v43_v1, %v42_v0  ;;  %v41_v4 = vld [vmem:[%s732_s0 + $0x68] sm:$0xff]  ;;  %v38_v8 = vld [vmem:[%s732_s0 + $0x50] sm:$0xff]  ;;  %v39_v9 = vld [vmem:[%s732_s0 + $0x58] sm:$0xff] }
   0x3   :  { %v50_v6 = vpack.c.bf16 %v41_v4, %v40_v2  ;;  %v521_v10 = vld [vmem:[%s733_s1] sm:$0xff]   ;;  %v49_v12 = vpack.c.bf16 %v39_v9, %v38_v8  ;;  %v66_v13 = vld [vmem:[%s734_s2 + $0x30] sm:$0xff]  ;;  %v67_v15 = vld [vmem:[%s734_s2 + $0x38] sm:$0xff] }
   0x4   :  { %507 = vmatprep.subr.msk.bf16.mxu0 %vm128_vm0, %v51_v3  ;;  %v163_v7 = vsel %vm128_vm0, %v51_v3, 0  ;;  %479 = vmatprep.mubr.msk.bf16.mxu0 %vm128_vm0, %v521_v10  ;;  %v64_v14 = vld [vmem:[%s734_s2 + $0x20] sm:$0xff]  ;;  %v65_v16 = vld [vmem:[%s734_s2 + $0x28] sm:$0xff]  ;;  %v62_v19 = vld [vmem:[%s734_s2 + $0x10] sm:$0xff] }
   0x5   :  { %464 = vmatpush3.bf16.xpose.msra.mxu0 %v163_v7  ;;  %v160_v11 = vsel %vm128_vm0, %v50_v6, 0  ;;  %100 = vperm.xlu0 %519, %v66_v13   ;;  %v36_v17 = vld [vmem:[%s732_s0 + $0x40] sm:$0xff]  ;;  %v37_v18 = vld [vmem:[%s732_s0 + $0x48] sm:$0xff] }
   0x6   :  { %508 = vmatprep.subr.msk.bf16.mxu0 %vm128_vm0, %v50_v6  ;;  %90 = vperm.xlu1 %520, %v64_v14  }
   0x9   :  { %105 = vperm.xlu0 %519, %v67_v15  }
   0xa   :  { %95 = vperm.xlu1 %520, %v65_v16  }
   0xd   :  { %466 = vmatpush3.bf16.xpose.msra.mxu0 %v160_v11 }
   0xe   :  { %509 = vmatprep.subr.msk.bf16.mxu0 %vm128_vm0, %v49_v12 }
   0xf   :  { %12 = vsyncpa [#allocation3], 0  ;;  %v63_v20 = vld [vmem:[%s734_s2 + $0x18] sm:$0xff]  ;;  %v157_v21 = vsel %vm128_vm0, %v49_v12, 0  ;;  %v48_v22 = vpack.c.bf16 %v37_v18, %v36_v17  ;;  %80 = vperm.xlu0 %519, %v62_v19   ;;  %v60_v23 = vld [vmem:[%s734_s2] sm:$0xff]  ;;  %vm280_vm1 = vcmask 523264  }
  0x10   :  { %85 = vperm.xlu1 %520, %v63_v20   ;;  %v61_v24 = vld [vmem:[%s734_s2 + $0x8] sm:$0xff]  ;;  %v34_v25 = vld [vmem:[%s732_s0 + $0x30] sm:$0xff]  ;;  %v35_v26 = vld [vmem:[%s732_s0 + $0x38] sm:$0xff]  ;;  %vm555_vm2 = vmmov 0   ;;  %vm349_vm3 = vcmask 261120   ;;  %vm394_vm4 = vcmask 1043456  }
  0x11   :  { %v248_v27 = vld [vmem:[%s736_s4 + $0x10] sm:$0xff]  ;;  %v249_v28 = vld [vmem:[%s736_s4 + $0x18] sm:$0xff]  ;;  %v154_v29 = vsel %vm128_vm0, %v48_v22, 0  ;;  %v47_v30 = vpack.c.bf16 %v35_v26, %v34_v25  ;;  %v246_v31 = vld [vmem:[%s736_s4] sm:$0xff] }
  0x12   :  { %v247_v32 = vld [vmem:[%s736_s4 + $0x8] sm:$0xff]  ;;  %v32_v33 = vld [vmem:[%s732_s0 + $0x20] sm:$0xff]  ;;  %v30_v38 = vld [vmem:[%s732_s0 + $0x10] sm:$0xff] }
  0x13   :  { %70 = vperm.xlu0 %519, %v60_v23   ;;  %v33_v34 = vld [vmem:[%s732_s0 + $0x28] sm:$0xff]  ;;  %v343_v35 = vld [vmem:[%s738_s6] sm:$0xf]  ;;  %v151_v36 = vsel %vm128_vm0, %v47_v30, 0  ;;  %v31_v39 = vld [vmem:[%s732_s0 + $0x18] sm:$0xff] }
  0x14   :  { %75 = vperm.xlu1 %520, %v61_v24   ;;  %v46_v37 = vpack.c.bf16 %v33_v34, %v32_v33  ;;  %v45_v41 = vpack.c.bf16 %v31_v39, %v30_v38  ;;  %v28_v42 = vld [vmem:[%s732_s0] sm:$0xff]  ;;  %v29_v43 = vld [vmem:[%s732_s0 + $0x8] sm:$0xff]  ;;  %v523_v48 = vld [vmem:[%s733_s1 + $0x10] sm:$0xff]   ;;  %v554_v24 = vmov 0.0  }
  0x15   :  { %468 = vmatpush3.bf16.xpose.msra.mxu0 %v157_v21  ;;  %v44_v45 = vpack.c.bf16 %v29_v43, %v28_v42  ;;  %v522_v47 = vld [vmem:[%s733_s1 + $0x8] sm:$0xff]   ;;  %v524_v49 = vld [vmem:[%s733_s1 + $0x18] sm:$0xff]   ;;  %v525_v50 = vld [vmem:[%s735_s3] sm:$0xff]  }
  0x16   :  { %510 = vmatprep.subr.msk.bf16.mxu0 %vm128_vm0, %v48_v22  ;;  %v148_v40 = vsel %vm128_vm0, %v46_v37, 0  ;;  %v145_v44 = vsel %vm128_vm0, %v45_v41, 0  ;;  %495 = vmatprep.mubr.msk.bf16.mxu1 %vm280_vm1, %v525_v50  ;;  %v526_v23 = vld [vmem:[%s735_s3 + $0x8] sm:$0xff]   ;;  %v342_v43 = vld [vmem:[%s737_s5] sm:$0x3]  ;;  %s556_s5 = smov [#allocation2]  }
  0x17   :  { %262 = vperm.xlu0 %519, %v248_v27   ;;  %v142_v46 = vsel %vm128_vm0, %v44_v45, 0  ;;  %s421_s20 = sshll.u32 %s556_s5, 4  ;;  %s422_s20 = int_to_ptr.vmem [resolvable:$true] %s421_s20 }
  0x18   :  { %267 = vperm.xlu1 %520, %v249_v28   ;;  %s531_s21 = scalar_lea.vmem %s422_s20, 64  ;;  %p536_p1 = scmp.lt.s32.totalorder %s422_s20, %s422_s20 }
  0x19   :  { %p532_p0 = scmp.ne.s32.totalorder %s422_s20, %s531_s21  ;;  %p537_p2 = scmp.lt.s32.totalorder %s531_s21, %s531_s21 }
  0x1b   :  { %252 = vperm.xlu0 %519, %v246_v31   ;;  %p538_p3 = por %p537_p2, %p536_p1 }
  0x1c   :  { %257 = vperm.xlu1 %520, %v247_v32  }
  0x1d   :  { %470 = vmatpush3.bf16.xpose.msra.mxu0 %v154_v29  ;;  %p539_p4 = pnand %p538_p3, %p532_p0 }
  0x1e   :  { %511 = vmatprep.subr.msk.bf16.mxu0 %vm128_vm0, %v47_v30 }
  0x1f   :  { %346 = vperm.xlu0 %519, %v343_v35  }
  0x25   :  { %472 = vmatpush3.bf16.xpose.msra.mxu0 %v151_v36 }
  0x26   :  { %512 = vmatprep.subr.msk.bf16.mxu0 %vm128_vm0, %v46_v37 }
  0x2d   :  { %474 = vmatpush3.bf16.xpose.msra.mxu0 %v148_v40 }
  0x2e   :  { %513 = vmatprep.subr.msk.bf16.mxu0 %vm128_vm0, %v45_v41 }
  0x35   :  { %476 = vmatpush3.bf16.xpose.msra.mxu0 %v145_v44 }
  0x36   :  { %514 = vmatprep.subr.msk.bf16.mxu0 %vm128_vm0, %v44_v45 }
  0x3d   :  { %478 = vmatpush3.bf16.xpose.msra.mxu0 %v142_v46 }
  0x44   :  { %480 = vmatmul.mubr.msk.bf16.vlgmr.msra.gmra.mxu0 %vm128_vm0, %v522_v47 }
  0x45   :  { %483 = vmatprep.mubr.msk.bf16.mxu0 %vm128_vm0, %v523_v48 }
  0x4c   :  { %484 = vmatmul.mubr.msk.bf16.gmra.mxu0 %vm128_vm0, %v524_v49 }
  0x80   :  { %v101_v53 = vpop.permute.xlu0 %100 }
  0x81   :  { %v91_v51 = vpop.permute.xlu1 %90 }
  0x84   :  { %v106_v58 = vpop.permute.xlu0 %105 }
  0x85   :  { %v96_v56 = vpop.permute.xlu1 %95 }
  0x8a   :  { %v81_v2 = vpop.permute.xlu0 %80 }
  0x8b   :  { %v86_v62 = vpop.permute.xlu1 %85 }
  0x8e   :  { %v71_v16 = vpop.permute.xlu0 %70 }
  0x8f   :  { %v76_v12 = vpop.permute.xlu1 %75 }
  0x92   :  { %v263_v25 = vpop.permute.xlu0 %262 }
  0x93   :  { %v268_v26 = vpop.permute.xlu1 %267 }
  0x96   :  { %v253_v31 = vpop.permute.xlu0 %252 }
  0x97   :  { %v258_v33 = vpop.permute.xlu1 %257 }
  0x9a   :  { %v347_v44 = vpop.permute.xlu0 %346 }
 0x104   :  { %v481_v52 = vpop.f32.mrf.mxu0 }
 0x105   :  { %v208_v8 = vadd.f32 %v481_v52, %v81_v2 }
 0x106   :  { %v199_v54 = vpop.f32.mrf.mxu0 }
 0x107   :  { %v232_v17 = vmax.f32 %v208_v8, 0.0  ;;  %v200_v18 = vadd.f32 %v199_v54, %v71_v16 }
 0x108   :  { %v482_v55 = vpop.f32.mrf.mxu0 }
 0x109   :  { %v211_v4 = vadd.f32 %v482_v55, %v86_v62  ;;  %v230_v21 = vmax.f32 %v200_v18, 0.0 }
 0x10a   :  { %v202_v57 = vpop.f32.mrf.mxu0 }
 0x10b   :  { %v233_v13 = vmax.f32 %v211_v4, 0.0  ;;  %v203_v14 = vadd.f32 %v202_v57, %v76_v12 }
 0x10c   :  { %v485_v59 = vpop.f32.mrf.mxu0 }
 0x10d   :  { %v224_v61 = vadd.f32 %v485_v59, %v101_v53  ;;  %v239_v19 = vpack.c.bf16 %v233_v13, %v232_v17  ;;  %v231_v20 = vmax.f32 %v203_v14, 0.0 }
 0x10e   :  { %v215_v60 = vpop.f32.mrf.mxu0 }
 0x10f   :  { %v216_v0 = vadd.f32 %v215_v60, %v91_v51  ;;  %v236_v5 = vmax.f32 %v224_v61, 0.0  ;;  %v238_v22 = vpack.c.bf16 %v231_v20, %v230_v21 }
 0x110   :  { %v486_v63 = vpop.f32.mrf.mxu0 }
 0x111   :  { %v227_v1 = vadd.f32 %v486_v63, %v106_v58  ;;  %v234_v9 = vmax.f32 %v216_v0, 0.0 }
 0x112   :  { %v218_v3 = vpop.f32.mrf.mxu0 }
 0x113   :  { %v237_v6 = vmax.f32 %v227_v1, 0.0  ;;  %v219_v7 = vadd.f32 %v218_v3, %v96_v56 }
 0x115   :  { %v235_v10 = vmax.f32 %v219_v7, 0.0  ;;  %v241_v11 = vpack.c.bf16 %v237_v6, %v236_v5 }
 0x117   :  { %v240_v15 = vpack.c.bf16 %v235_v10, %v234_v9  ;;  %487 = vmatprep.subr.bf16.mxu1 %v241_v11 }
 0x118   :  { %488 = vmatpush3.bf16.msra.mxu1 %v241_v11 }
 0x119   :  { %489 = vmatprep.subr.bf16.mxu1 %v240_v15 }
 0x11c   :  { %490 = vmatpush3.bf16.msra.mxu1 %v240_v15 }
 0x11d   :  { %491 = vmatprep.subr.bf16.mxu1 %v239_v19 }
 0x120   :  { %492 = vmatpush3.bf16.msra.mxu1 %v239_v19 }
 0x121   :  { %493 = vmatprep.subr.bf16.mxu1 %v238_v22 }
 0x124   :  { %494 = vmatpush3.bf16.msra.mxu1 %v238_v22 }
 0x125   :  { %499 = vmatprep.subr.bf16.mxu1 %v554_v24 }
 0x127   :  { %496 = vmatmul.mubr.msk.bf16.vlgmr.msra.gmra.mxu1 %vm280_vm1, %v526_v23 }
 0x128   :  { %503 = vmatprep.mubr.msk.bf16.mxu1 %vm555_vm2, %v554_v24 }
 0x1e7   :  { %v497_v27 = vpop.f32.mrf.mxu1 }
 0x1e8   :  { %v330_v29 = vadd.f32 %v497_v27, %v263_v25 }
 0x1e9   :  { %v321_v28 = vpop.f32.mrf.mxu1 }
 0x1ea   :  { %v338_v35 = vmax.f32 %v330_v29, 0.0  ;;  %v322_v36 = vadd.f32 %v321_v28, %v253_v31 }
 0x1eb   :  { %v498_v30 = vpop.f32.mrf.mxu1 }
 0x1ec   :  { %v333_v32 = vadd.f32 %v498_v30, %v268_v26  ;;  %v336_v41 = vmax.f32 %v322_v36, 0.0 }
 0x1ed   :  { %v324_v34 = vpop.f32.mrf.mxu1 }
 0x1ee   :  { %v339_v37 = vmax.f32 %v333_v32, 0.0  ;;  %v325_v38 = vadd.f32 %v324_v34, %v258_v33 }
 0x1f0   :  { %v341_v39 = vpack.c.bf16 %v339_v37, %v338_v35  ;;  %v337_v40 = vmax.f32 %v325_v38, 0.0 }
 0x1f2   :  { %500 = vmatpush3.bf16.msra.mxu1 %v341_v39  ;;  %v340_v42 = vpack.c.bf16 %v337_v40, %v336_v41 }
 0x1f3   :  { %501 = vmatprep.subr.bf16.mxu1 %v554_v24 }
 0x1f6   :  { %502 = vmatpush3.bf16.msra.mxu1 %v340_v42 }
 0x1f9   :  { %504 = vmatmul.mubr.msk.bf16.vlgmr.msra.gmra.mxu1 %vm349_vm3, %v342_v43 }
 0x2b9   :  { %v387_v45 = vpop.f32.mrf.mxu1 }
 0x2ba   :  { %v388_v46 = vadd.f32 %v387_v45, %v347_v44 }
 0x2bb   :  { %v505_v47 = vpop.f32.mrf.mxu1 }
 0x2bc   :  { %v393_v48 = vmax.f32 %v388_v46, 0.0 }
 0x2bd   :  { %v390_v49 = vpop.f32.mrf.mxu1 }
 0x2be   :  { %v395_v50 = vsel %vm394_vm4, %v393_v48, -inf }
 0x2bf   :  { %v396_v51 = vrot.slane %v395_v50, 4  ;;  %v506_v52 = vpop.f32.mrf.mxu1 }
 0x2c1   :  { %v397_v53 = vmax.f32 %v395_v50, %v396_v51 }
 0x2c3   :  { %v398_v54 = vrot.slane %v397_v53, 2 }
 0x2c5   :  { %v399_v55 = vmax.f32 %v397_v53, %v398_v54 }
 0x2c7   :  { %v400_v56 = vrot.slane %v399_v55, 1 }
 0x2c9   :  { %v401_v57 = vmax.f32 %v399_v55, %v400_v56 }
 0x2cb   :  { %v402_v58 = vsub.f32 %v393_v48, %v401_v57 }
 0x2cd   :  { %v403_v59 = vmul.f32 1.442695, %v402_v58 }
 0x2cf   :  { %527 = vpow2.f32 %v403_v59 }
 0x2dc   :  { %v528_v60 = vpop.eup %527 }
 0x2dd   :  { %v405_v61 = vsel %vm394_vm4, %v528_v60, 0.0 }
 0x2de   :  { %v406_v62 = vrot.slane %v405_v61, 4 }
 0x2e0   :  { %v407_v63 = vadd.f32 %v406_v62, %v405_v61 }
 0x2e2   :  { %v408_v0 = vrot.slane %v407_v63, 2 }
 0x2e4   :  { %v409_v1 = vadd.f32 %v408_v0, %v407_v63 }
 0x2e6   :  { %v410_v2 = vrot.slane %v409_v1, 1 }
 0x2e8   :  { %v411_v3 = vadd.f32 %v410_v2, %v409_v1 }
 0x2ea   :  { %529 = vrcp.f32 %v411_v3 }
 0x2f7   :  { %v530_v4 = vpop.eup %529 }
 0x2f8   :  { %v413_v5 = vmul.f32 %v530_v4, %v528_v60 }
 0x2fa   :  { %414 = vst [vmem:[#allocation2] sm:$0xf] %v413_v5 }
 0x2fb   :  { %542 = shalt.err (!%p539_p4)
}
 0x2fc   :  { %424 = dma.vmem_to_hbm [thread:$0]  %s422_s20, 64, %s739_s7, [#allocation3]  }
 0x2fd   :  { %551 = dma.done.wait [#allocation3], 64  }
 0x2fe   :  { %552 = vsyncadd [#allocation3], 4294967232 }
 0x2ff   :  { %428 = vsyncpa [#allocation3], 1 }

</bundles_post_ra>
